<compile_context>
chip_gen: v7x
topology: tpu7x:2x2x1
jax: 0.10.0
libtpu: 0.0.40
codegen_flags: <defaults>
</compile_context>

<pallas_src>
import functools

import jax
import jax.numpy as jnp
from jax import lax
from jax.experimental import pallas as pl
from jax.experimental.pallas import tpu as pltpu

EPS = 1e-5
LEAKY_SLOPE = 0.1

# Conservative live-VMEM budget for strip sizing: fits v7x's 64 MiB physical VMEM
# per TensorCore with headroom (v5e/v6e have 128 MiB, so this is safe everywhere).
_VMEM_LIVE_BUDGET = 40 << 20


# ---------------------------------------------------------------------------
# Pallas kernel: one (batch, row-strip) tile
# ---------------------------------------------------------------------------
def upsample_kernel(x_ref, w_ref, b_ref, o_ref, *, leaky_slope):
    _, TH, W, Cin = x_ref.shape
    Cout = w_ref.shape[1]

    # 1x1 conv == one MXU matmul over the (TH*W, Cin) slab; eval-mode BN already
    # folded into w/b on the host.  The wrapper pads W to the sublane tile so this
    # reshape is a clean relayout and stores stay unmasked.
    x = x_ref[0].reshape(TH * W, Cin)
    y = jnp.dot(x, w_ref[...], preferred_element_type=jnp.float32)
    y = y + b_ref[...]                              # folded BN bias (f32)
    y = jnp.where(y >= 0.0, y, leaky_slope * y)     # LeakyReLU(0.1) in f32
    y = y.astype(o_ref.dtype).reshape(TH, W, Cout)

    # Nearest-neighbour x2 fused into the store.  The out block (1, TH, 2, W, 2*Cout)
    # has the same memory layout as NHWC (2*TH, 2*W, Cout):
    #   width duplication -> lane-axis concat  [y | y]   (lane width 2*Cout)
    #   height duplication -> broadcast over the size-2 leading axis
    yw = jnp.concatenate([y, y], axis=-1)           # (TH, W, 2*Cout)
    o_ref[0] = jnp.broadcast_to(yw[:, None], (TH, 2, W, 2 * Cout))


# ---------------------------------------------------------------------------
# Strip sizing helpers
# ---------------------------------------------------------------------------
def _live_vmem_bytes(th, wp, cin, cout, in_itemsize, out_itemsize):
    # double-buffered input block + double-buffered output block + weights + bias
    return (2 * th * wp * cin * in_itemsize
            + 2 * th * 2 * wp * 2 * cout * out_itemsize
            + cin * cout * in_itemsize
            + 4 * cout)


def _choose_tile_h(n, h, wp, cin, cout, in_itemsize, out_itemsize):
    divisors = [d for d in range(1, h + 1) if h % d == 0]
    fitting = [d for d in divisors
               if _live_vmem_bytes(d, wp, cin, cout, in_itemsize, out_itemsize)
               <= _VMEM_LIVE_BUDGET]
    if not fitting:
        return 1
    th = max(fitting)
    # v7x megacore: "parallel" only shards across the 2 TensorCores if a parallel
    # grid axis has extent >= 2.  With N == 1 that has to come from the H axis.
    if n == 1 and h // th < 2:
        smaller = [d for d in fitting if h // d >= 2]
        if smaller:
            th = max(smaller)
    return th


# ---------------------------------------------------------------------------
# Wrapper: NCHW <-> NHWC glue + pallas_call
# ---------------------------------------------------------------------------
def upsample_forward(x_nchw, params, *, compute_dtype=jnp.bfloat16,
                     out_dtype=None, out_layout="NCHW"):
    """Fused 1x1 conv + (folded) BN + LeakyReLU(0.1) + nearest 2x upsample.

    out_layout="NHWC" skips the post-kernel transpose over the 4x-sized output;
    use it whenever the consumer (next conv) accepts NHWC.
    """
    if out_dtype is None:
        out_dtype = compute_dtype
    N, Cin, H, W = x_nchw.shape
    Cout = params["w"].shape[1]

    in_itemsize = jnp.dtype(compute_dtype).itemsize
    out_itemsize = jnp.dtype(out_dtype).itemsize

    # Pad W to the sublane tile (f32 -> 8, bf16 -> 16) so the in-kernel reshape is
    # layout-clean and output stores are unmasked (relevant for YOLO's 13x13 maps).
    sublane = {4: 8, 2: 16, 1: 32}.get(in_itemsize, 8)
    Wp = ((W + sublane - 1) // sublane) * sublane

    # TODO(synk): if the producing layer can emit NHWC (or via allow_input_fusion),
    # this standalone NCHW->NHWC transpose of the input disappears.
    x = jnp.transpose(x_nchw, (0, 2, 3, 1)).astype(compute_dtype)   # NHWC
    if Wp != W:
        x = jnp.pad(x, ((0, 0), (0, 0), (0, Wp - W), (0, 0)))

    w = params["w"].astype(compute_dtype)                           # (Cin, Cout)
    b = params["b"].astype(jnp.float32).reshape(1, Cout)            # folded BN bias

    TH = _choose_tile_h(N, H, Wp, Cin, Cout, in_itemsize, out_itemsize)
    live = _live_vmem_bytes(TH, Wp, Cin, Cout, in_itemsize, out_itemsize)
    vmem_limit = int(min(max(2 * live + (2 << 20), 16 << 20), 48 << 20))

    flops = 2 * N * H * Wp * Cin * Cout
    bytes_accessed = (N * H * Wp * Cin * in_itemsize          # activation in
                      + Cin * Cout * in_itemsize + 4 * Cout   # weights + bias
                      + N * 4 * H * Wp * Cout * out_itemsize)  # upsampled output

    kernel = functools.partial(upsample_kernel, leaky_slope=LEAKY_SLOPE)

    out = pl.pallas_call(
        kernel,
        out_shape=jax.ShapeDtypeStruct((N, H, 2, Wp, 2 * Cout), out_dtype),
        grid=(N, H // TH),
        in_specs=[
            pl.BlockSpec((1, TH, Wp, Cin), lambda n, h: (n, h, 0, 0)),
            pl.BlockSpec((Cin, Cout), lambda n, h: (0, 0)),
            pl.BlockSpec((1, Cout), lambda n, h: (0, 0)),
        ],
        out_specs=pl.BlockSpec((1, TH, 2, Wp, 2 * Cout),
                               lambda n, h: (n, h, 0, 0, 0)),
        compiler_params=pltpu.CompilerParams(
            dimension_semantics=("parallel", "parallel"),
            vmem_limit_bytes=vmem_limit),
        cost_estimate=pl.CostEstimate(
            flops=flops, transcendentals=0, bytes_accessed=bytes_accessed),
    )(x, w, b)

    # (N, H, 2, Wp, 2*Cout) is bit-identical memory to NHWC (N, 2H, 2Wp, Cout): free.
    out = out.reshape(N, 2 * H, 2 * Wp, Cout)
    if Wp != W:
        out = out[:, :, :2 * W, :]                  # drop duplicated padding columns
    if out_layout == "NHWC":
        return out
    return jnp.transpose(out, (0, 3, 1, 2))         # NCHW, done in out_dtype


# ---------------------------------------------------------------------------
# Deterministic params + eval-mode BatchNorm folding
# ---------------------------------------------------------------------------
def init_params(key, Cin, Cout):
    k1, k2, k3, k4, k5 = jax.random.split(key, 5)
    w = 0.1 * jax.random.normal(k1, (Cin, Cout), jnp.float32)   # 1x1 conv, bias=False
    gamma = jax.random.uniform(k2, (Cout,), jnp.float32, 0.5, 1.5)
    beta = 0.1 * jax.random.normal(k3, (Cout,), jnp.float32)
    mean = 0.1 * jax.random.normal(k4, (Cout,), jnp.float32)
    var = jax.random.uniform(k5, (Cout,), jnp.float32, 0.5, 1.5)
    raw = {"w": w, "bn": (gamma, beta, mean, var)}

    # TODO(synk): training-mode BatchNorm (batch stats + running-stat update) is not
    # implemented; eval-mode BN is folded into the conv weight and bias.
    s = gamma / jnp.sqrt(var + EPS)
    folded = {"w": w * s[None, :], "b": beta - mean * s}
    return folded, raw


# ---------------------------------------------------------------------------
# Pure-JAX reference mirroring the PyTorch module (NCHW, unfused)
# ---------------------------------------------------------------------------
def ref_upsample(x, raw):
    w_oihw = raw["w"].T[:, :, None, None]                  # (Cout, Cin, 1, 1)
    y = lax.conv_general_dilated(x, w_oihw, (1, 1), [(0, 0), (0, 0)],
                                 dimension_numbers=("NCHW", "OIHW", "NCHW"))
    g, b, m, v = raw["bn"]
    y = (y - m[None, :, None, None]) / jnp.sqrt(v[None, :, None, None] + EPS)
    y = y * g[None, :, None, None] + b[None, :, None, None]
    y = jnp.where(y >= 0.0, y, LEAKY_SLOPE * y)            # LeakyReLU(0.1)
    y = jnp.repeat(jnp.repeat(y, 2, axis=2), 2, axis=3)    # nearest x2
    return y


if __name__ == "__main__":
    key = jax.random.PRNGKey(0)
    kx, kx2, kp = jax.random.split(key, 3)

    # Small shapes consistent with the module; Cout=64 -> 2*Cout=128 lanes so the
    # fused-upsample output stores are fully lane-dense.
    N, Cin, H, W = 2, 32, 16, 16
    Cout = 64

    x = jax.random.normal(kx, (N, Cin, H, W), jnp.float32)
    folded, raw = init_params(kp, Cin, Cout)
    ref = ref_upsample(x, raw)

    # 1) f32 compute + f32 output, NCHW: tight structural check (BN fold, LeakyReLU,
    #    fused-upsample placement).
    out_f32 = jax.block_until_ready(
        upsample_forward(x, folded, compute_dtype=jnp.float32))
    assert out_f32.shape == (N, Cout, 2 * H, 2 * W), out_f32.shape
    err_f32 = float(jnp.max(jnp.abs(out_f32 - ref)))
    assert err_f32 < 1e-3, f"f32 max abs err {err_f32}"

    # 2) Performance configuration: bf16 compute + bf16 output, NHWC (no post-kernel
    #    transpose over the 4x-sized tensor).  Tolerance loosened only for bf16.
    out_bf16 = jax.block_until_ready(
        upsample_forward(x, folded, compute_dtype=jnp.bfloat16, out_layout="NHWC"))
    assert out_bf16.shape == (N, 2 * H, 2 * W, Cout), out_bf16.shape
    ref_nhwc = jnp.transpose(ref, (0, 2, 3, 1))
    err_bf16 = float(jnp.max(jnp.abs(out_bf16.astype(jnp.float32) - ref_nhwc)))
    assert err_bf16 < 1e-1, f"bf16 max abs err {err_bf16}"

    # 3) Production-like odd spatial size (YOLO 13x13 map): exercises the W-padding
    #    path; NCHW output to match the PyTorch module interface.
    H2 = W2 = 13
    x2 = jax.random.normal(kx2, (N, Cin, H2, W2), jnp.float32)
    ref2 = ref_upsample(x2, raw)
    out2 = jax.block_until_ready(
        upsample_forward(x2, folded, compute_dtype=jnp.bfloat16))
    assert out2.shape == (N, Cout, 2 * H2, 2 * W2), out2.shape
    err2 = float(jnp.max(jnp.abs(out2.astype(jnp.float32) - ref2)))
    assert err2 < 1e-1, f"bf16 (padded-W) max abs err {err2}"

    print("KERNEL_OK")
</pallas_src>

<mosaic_0001>
module attributes {stable_mosaic.version = 11 : i64} {
  func.func @upsample_kernel(%arg0: i32, %arg1: i32, %arg2: memref<1x16x16x32xf32, #tpu.memory_space<vmem>>, %arg3: memref<32x64xf32, #tpu.memory_space<vmem>>, %arg4: memref<1x64xf32, #tpu.memory_space<vmem>>, %arg5: memref<1x16x2x16x128xf32, #tpu.memory_space<vmem>>) attributes {dimension_semantics = [#tpu.dimension_semantics<parallel>, #tpu.dimension_semantics<parallel>], iteration_bounds = array<i64: 2, 1>, scalar_prefetch = 0 : i64, scratch_operands = 0 : i64, tpu.core_type = #tpu.core_type<tc>, window_params = [{transform_indices = @transform_0, window_bounds = array<i64: 1, 16, 16, 32>}, {pipeline_mode = #tpu.pipeline_mode<synchronous>, transform_indices = @transform_1, window_bounds = array<i64: 32, 64>}, {pipeline_mode = #tpu.pipeline_mode<synchronous>, transform_indices = @transform_2, window_bounds = array<i64: 1, 64>}, {transform_indices = @transform_3, window_bounds = array<i64: 1, 16, 2, 16, 128>}]} {
    %c0 = arith.constant 0 : index
    %c0_0 = arith.constant 0 : index
    %c0_1 = arith.constant 0 : index
    %c0_2 = arith.constant 0 : index
    %0 = vector.load %arg2[%c0, %c0_0, %c0_1, %c0_2] : memref<1x16x16x32xf32, #tpu.memory_space<vmem>>, vector<1x16x16x32xf32>
    %1 = vector.shape_cast %0 : vector<1x16x16x32xf32> to vector<16x16x32xf32>
    %2 = vector.shape_cast %1 : vector<16x16x32xf32> to vector<256x32xf32>
    %c0_3 = arith.constant 0 : index
    %c0_4 = arith.constant 0 : index
    %3 = vector.load %arg3[%c0_3, %c0_4] : memref<32x64xf32, #tpu.memory_space<vmem>>, vector<32x64xf32>
    %cst = arith.constant dense<0.000000e+00> : vector<256x64xf32>
    %4 = tpu.matmul %2, %3, %cst {dimension_numbers = #tpu.dot_dimension_numbers<[1], [0], [0], [1], [0, 0, 1, 1], [], []>} : vector<256x32xf32>, vector<32x64xf32>, vector<256x64xf32> -> vector<256x64xf32>
    %c0_5 = arith.constant 0 : index
    %c0_6 = arith.constant 0 : index
    %5 = vector.load %arg4[%c0_5, %c0_6] : memref<1x64xf32, #tpu.memory_space<vmem>>, vector<1x64xf32>
    %6 = vector.broadcast %5 : vector<1x64xf32> to vector<256x64xf32>
    %7 = arith.addf %4, %6 : vector<256x64xf32>
    %cst_7 = arith.constant 0.000000e+00 : f32
    %8 = vector.broadcast %cst_7 : f32 to vector<256x64xf32>
    %9 = arith.cmpf oge, %7, %8 : vector<256x64xf32>
    %cst_8 = arith.constant 1.000000e-01 : f32
    %10 = vector.broadcast %cst_8 : f32 to vector<256x64xf32>
    %11 = arith.mulf %10, %7 : vector<256x64xf32>
    %12 = arith.select %9, %7, %11 : vector<256x64xi1>, vector<256x64xf32>
    %13 = vector.shape_cast %12 : vector<256x64xf32> to vector<16x16x64xf32>
    %14 = tpu.concatenate %13, %13 in 2 : vector<16x16x64xf32>, vector<16x16x64xf32> -> vector<16x16x128xf32>
    %15 = vector.shape_cast %14 : vector<16x16x128xf32> to vector<16x1x16x128xf32>
    %16 = vector.shape_cast %15 : vector<16x1x16x128xf32> to vector<16x1x16x128xf32>
    %17 = vector.broadcast %16 : vector<16x1x16x128xf32> to vector<16x2x16x128xf32>
    %c0_9 = arith.constant 0 : index
    %c0_10 = arith.constant 0 : index
    %c0_11 = arith.constant 0 : index
    %c0_12 = arith.constant 0 : index
    %c0_13 = arith.constant 0 : index
    %18 = vector.load %arg5[%c0_9, %c0_10, %c0_11, %c0_12, %c0_13] : memref<1x16x2x16x128xf32, #tpu.memory_space<vmem>>, vector<1x16x2x16x128xf32>
    %19 = vector.shape_cast %18 : vector<1x16x2x16x128xf32> to vector<16x2x16x128xf32>
    %20 = vector.shape_cast %17 : vector<16x2x16x128xf32> to vector<1x16x2x16x128xf32>
    tpu.vector_store %arg5[%c0_9, %c0_10, %c0_11, %c0_12, %c0_13], %20 {strides = array<i32>} : memref<1x16x2x16x128xf32, #tpu.memory_space<vmem>>, vector<1x16x2x16x128xf32>,
    return
  }
  func.func @transform_0(%arg0: i32, %arg1: i32) -> (i32, i32, i32, i32) {
    %c0_i32 = arith.constant 0 : i32
    %c0_i32_0 = arith.constant 0 : i32
    %c0_i32_1 = arith.constant 0 : i32
    return %arg0, %arg1, %c0_i32, %c0_i32_0 : i32, i32, i32, i32
  }
  func.func @transform_1(%arg0: i32, %arg1: i32) -> (i32, i32) {
    %c0_i32 = arith.constant 0 : i32
    %c0_i32_0 = arith.constant 0 : i32
    %c0_i32_1 = arith.constant 0 : i32
    return %c0_i32, %c0_i32_0 : i32, i32
  }
  func.func @transform_2(%arg0: i32, %arg1: i32) -> (i32, i32) {
    %c0_i32 = arith.constant 0 : i32
    %c0_i32_0 = arith.constant 0 : i32
    %c0_i32_1 = arith.constant 0 : i32
    return %c0_i32, %c0_i32_0 : i32, i32
  }
  func.func @transform_3(%arg0: i32, %arg1: i32) -> (i32, i32, i32, i32, i32) {
    %c0_i32 = arith.constant 0 : i32
    %c0_i32_0 = arith.constant 0 : i32
    %c0_i32_1 = arith.constant 0 : i32
    %c0_i32_2 = arith.constant 0 : i32
    return %arg0, %arg1, %c0_i32, %c0_i32_0, %c0_i32_1 : i32, i32, i32, i32, i32
  }
}

</mosaic_0001>

<bundles_post_ra>
// kernel: tpu_custom_call.1
= control target key start
LH: loop header
LB: loop body
LE: loop exit
PB: predicated region body
PF: predicated region fallthrough
CT: control target
= control target key end

     0   :  { %8 = vsyncpa [#allocation3], 0  ;;  %s2030_s0 = inlined_call_operand.hbm [shape: f32[2,16,16,32], index: 0, kind: input, shape index: {}]   ;;  %s2031_s1 = inlined_call_operand.hbm [shape: f32[32,64], index: 1, kind: input, shape index: {}]   ;;  %s2032_s2 = inlined_call_operand.vmem [shape: f32[1,64], index: 2, kind: input, shape index: {}]   ;;  %s2033_s3 = inlined_call_operand.hbm [shape: f32[2,16,2,16,128], index: 3, kind: output, shape index: {}]  }
   0x1   :  { %10 = vsyncpa [#allocation3 + $0x1], 0 }
   0x2   :  { %11 = vsyncpa [#allocation6], 0 }
   0x3   :  { %12 = vsyncpa [#allocation4], 0 }
   0x4   :  { %14 = vsyncpa [#allocation4 + $0x1], 0  ;;  %s1433_s12 = smov 0   ;;  %s1435_s13 = smov 0  }
   0x5   :  { %s1437_s14 = smov 0   ;;  %s1439_s15 = smov 0  }
   0x6   :  { %s1441_s16 = smov 0   ;;  %s1443_s17 = smov 0  }
   0x7 LB: > { %s1025_s18 = sadd.s32 4294967295, %s1403_s17   ;;  %s1026_s19 = sadd.s32 4294967294, %s1403_s17   ;;  %s1403_s17 = sphi %s1443_s17, %s20_s17   ;;  %s1399_s16 = sphi %s1441_s16, %s2057_s16   ;;  %s1395_s15 = sphi %s1439_s15, %s2056_s15   ;;  %s1391_s14 = sphi %s1437_s14, %s2055_s14   ;;  %s1387_s13 = sphi %s1435_s13, %s2054_s13   ;;  %s1383_s12 = sphi %s1433_s12, %s2053_s12  }
   0x8   : > { %p54_p0 = scmp.ne.s32.totalorder %s1387_s13, %s1383_s12  ;;  %p1467_p1 = scmp.eq.s32.totalorder %s1025_s18, 0 }
   0x9   : > { %p1471_p2 = scmp.eq.s32.totalorder %s1025_s18, 1  ;;  %p128_p3 = scmp.eq.s32.totalorder %s1026_s19, 1 }
   0xa   : > { %s2038_s20 = scalar_select %p1467_p1, 1, 0 }
   0xb   : > { %s2039_s21 = scalar_select %p1471_p2, 1, 0 }
   0xc   : > { %p1477_p4 = por %p1467_p1, %p54_p0  ;;  %p1027_p5 = scmp.ge.s32.totalorder %s1403_s17, 1 }
   0xd   : > { %p1482_p6 = por %p128_p3, %p54_p0  ;;  %p135_p7 = scmp.lt.s32.totalorder %s1403_s17, 3 }
   0xe   : > { %s2040_s22 = scalar_select %p1477_p4, 1, 0 }
   0xf   : > { %s2041_s23 = scalar_select %p1482_p6, 1, 0 }
  0x10   : > { %p1487_p8 = pnand %p1027_p5, %p135_p7  ;;  %s1405_s25 = smov [#allocation5]  }
  0x11   : > { %s147_s26 = sshll.u32 %s1405_s25, 4  ;;  %s32_s28 = sadd.s32 1, %s1399_s16  ;;  %s148_s26 = int_to_ptr.vmem [resolvable:$true] %s147_s26 }
  0x12   : > { %s2042_s24 = scalar_select %p1487_p8, 1, 0 }
  0x13   : > { %p1189_p9 = pneg %p1487_p8  ;;  %s1259_s4 = scalar_lea.hbm %s2031_s1, 512 }
  0x14   : > { %p1260_p12 = scmp.ne.s32.totalorder %s2031_s1, %s1259_s4  ;;  %p1266_p5 = scmp.lt.u32.totalorder %s1259_s4, %s2031_s1 }
  0x15   : > { %p1496_p11 = pnand %p1189_p9, %p1467_p1 }
  0x17   : > { %p1261_p13 = pneg %p1496_p11 }
  0x19   : > { %p1262_p0 = pnand %p1261_p13, %p1260_p12 }
  0x1b   : > { %p1263_p3 = pneg %p1262_p0 }
  0x1d   : > { %p1268_p7 = pnand %p1266_p5, %p1263_p3 }
  0x1f   : > { %1271 = shalt.err (!%p1268_p7)
}
  0x20   : > { %s1272_s9 = scalar_lea.vmem %s148_s26, 512  ;;  %p1280_p1 = scmp.lt.s32.totalorder %s148_s26, %s148_s26 }
  0x21   : > { %p1273_p9 = scmp.ne.s32.totalorder %s148_s26, %s1272_s9  ;;  %p1281_p4 = scmp.lt.s32.totalorder %s1272_s9, %s1272_s9 }
  0x23   : > { %p1275_p10 = pnand %p1273_p9, %p1261_p13  ;;  %p1282_p8 = por %p1281_p4, %p1280_p1 }
  0x25   : > { %p1276_p6 = pneg %p1275_p10 }
  0x27   : > { %p1283_p2 = pnand %p1282_p8, %p1276_p6 }
  0x29   : > { %1286 = shalt.err (!%p1283_p2)
}
  0x2a   : > { %s1406_s10 = smov 128   ;;  %s1407_s11 = smov 8  }
  0x2b   : > { %1192 = dma.hbm_to_vmem [thread:$0]  (!%p1496_p11), %s2031_s1, 512, %s148_s26, [#allocation6], %s1406_s10, %s1406_s10, %s1407_s11  }
  0x2c   : > { %p34_p1 = scmp.ge.s32.totalorder %s32_s28, 2  ;;  %s41_s25 = sadd.s32 1, %s1391_s14 }
  0x2d   : > { %p48_p2 = scmp.ne.s32.totalorder %s1391_s14, %s1387_s13  ;;  %p49_p4 = scmp.eq.s32.totalorder %s1403_s17, 0 }
  0x2e   : > { %s2059_s28 = smov (%p34_p1, %s32_s28), 0  ;;  %p2045_p8 = scmp.ne.s32.totalorder %s2039_s21, 0 }
  0x2f   : > { %p1526_p6 = por %p49_p4, %p48_p2  ;;  %s36_s30 = ssub.s32 %s1399_s16, %s2059_s28 }
  0x30   : > { %p1532_p10 = por %p2045_p8, %p48_p2  ;;  %p1202_p12 = scmp.lt.s32.totalorder %s1403_s17, 2 }
  0x31   : > { %p39_p11 = scmp.eq.s32.totalorder %s36_s30, 0  ;;  %s164_s26 = sand.u32 1, %s1391_s14  }
  0x32   : > { %s1030_s4 = sshll.u32 %s164_s26, 8  ;;  %s1075_s6 = sshll.u32 %s1399_s16, 12 }
  0x33   : > { %s1541_s5 = scalar_select %p39_p11, %s1391_s14, %s41_s25  }
  0x34   : > { %s1547_s9 = scalar_lea.hbm %s2030_s0, %s1075_s6  ;;  %s168_s21 = scalar_lea.vmem [#allocation2], %s1030_s4 }
  0x35   : > { %s178_s18 = sshll.u32 %s168_s21, 4  ;;  %p1553_p13 = pnand %p1202_p12, %p1526_p6  ;;  %s1549_s18 = int_to_ptr.vmem [resolvable:$true] %s178_s18 }
  0x36   : > { %s1557_s25 = scalar_lea.sflag [#allocation3], %s164_s26  ;;  %s1287_s30 = scalar_lea.hbm %s1547_s9, 4096 }
  0x37   : > { %p1288_p0 = scmp.ne.s32.totalorder %s1547_s9, %s1287_s30  ;;  %p1289_p3 = pneg %p1553_p13 }
  0x38   : > { %s1292_s29 = scalar_lea.hbm %s2030_s0, 8192  ;;  %p1293_p9 = scmp.lt.u32.totalorder %s1547_s9, %s2030_s0 }
  0x39   : > { %p1290_p5 = pnand %p1289_p3, %p1288_p0  ;;  %p1294_p1 = scmp.lt.u32.totalorder %s1292_s29, %s1287_s30 }
  0x3a   : > { %p1296_p4 = scmp.lt.u32.totalorder %s1287_s30, %s1547_s9 }
  0x3b   : > { %p1291_p7 = pneg %p1290_p5  ;;  %p1295_p2 = por %p1294_p1, %p1293_p9 }
  0x3d   : > { %p1297_p6 = por %p1296_p4, %p1295_p2 }
  0x3f   : > { %p1298_p8 = pnand %p1297_p6, %p1291_p7 }
  0x41   : > { %1301 = shalt.err (!%p1298_p8)
}
  0x42   : > { %s1302_s26 = scalar_lea.vmem %s1549_s18, 4096  ;;  %s1408_s21 = smov [#allocation2]  }
  0x43   : > { %p1303_p12 = scmp.ne.s32.totalorder %s1549_s18, %s1302_s26  ;;  %s1307_s4 = sshll.u32 %s1408_s21, 4  ;;  %s1308_s4 = int_to_ptr.vmem [resolvable:$false] %s1307_s4 }
  0x44   : > { %s1309_s6 = scalar_lea.vmem %s1308_s4, 8192  ;;  %p1310_p5 = scmp.lt.s32.totalorder %s1549_s18, %s1308_s4 }
  0x45   : > { %p1305_p11 = pnand %p1303_p12, %p1289_p3  ;;  %p1311_p9 = scmp.lt.s32.totalorder %s1309_s6, %s1302_s26 }
  0x47   : > { %p1306_p0 = pneg %p1305_p11  ;;  %p1312_p1 = por %p1311_p9, %p1310_p5 }
  0x49   : > { %p1313_p2 = pnand %p1312_p1, %p1306_p0 }
  0x4b   : > { %1316 = shalt.err (!%p1313_p2)
}
  0x4c   : > { %1196 = dma.hbm_to_vmem [thread:$0]  (!%p1553_p13), %s1547_s9, 4096, %s1549_s18, %s1557_s25, %s1406_s10, %s1406_s10, %s1407_s11  }
  0x4d   : > { %p2048_p3 = scmp.ne.s32.totalorder %s2042_s24, 0 }
  0x4e   : > { %s1591_s30 = sand.u32 (!%p2048_p3), 1, %s1387_s13   ;;  %p2049_p7 = scmp.ne.s32.totalorder (!%p2048_p3), %s2040_s22, 0 }
  0x4f   : > { %190 = sbr.rel (%p2048_p3) target bundleno = 510 (0x1fe), region = 32  ;;  %s1034_s29 = sshll.u32 (!%p2048_p3), %s1591_s30, 8 }
  0x50   : > { %s193_s7 = scalar_lea.sflag (!%p2048_p3), [#allocation3], %s1591_s30  ;;  %s1595_s8 = scalar_lea.vmem (!%p2048_p3), [#allocation2], %s1034_s29 }
  0x56   : > { %1370 = dma.done.wait (%p2049_p7), %s193_s7, 4096  }
  0x57   : > { %1372 = vsyncadd (%p2049_p7), %s193_s7, 4294963200  ;;  %p2050_p13 = scmp.ne.s32.totalorder %s2038_s20, 0 }
  0x59   : > { %1374 = dma.done.wait (%p2050_p13), [#allocation6], 512  }
  0x5a   : > { %1376 = vsyncadd (%p2050_p13), [#allocation6], 4294966784  ;;  %vm268_vm0 = vcmask 261120   ;;  %v257_v0 = vld [vmem:[#allocation5] sm:$0xff]  ;;  %v258_v1 = vld [vmem:[#allocation5 + $0x8] sm:$0xff]  ;;  %s1409_s24 = smov 64  }
  0x5b   : > { %v259_v2 = vld [vmem:[#allocation5 + $0x10] sm:$0xff]  ;;  %v1169_v3 = vpack.c.bf16 %v258_v1, %v257_v0  ;;  %v260_v4 = vld [vmem:[#allocation5 + $0x18] sm:$0xff]  ;;  %v225_v5 = vld [vmem:[%s1595_s8] sm:$0xff]  ;;  %s1036_s10 = sshll.u32 %s1591_s30, 9  ;;  %s1076_s9 = sshll.u32 %s1395_s15, 13 }
  0x5c   : > { %v241_v6 = vld [vmem:[%s1595_s8 + $0x80] sm:$0xff]  ;;  %v1173_v7 = vpack.c.bf16 %v260_v4, %v259_v2  ;;  %1121 = vmatprep.mubr.msk.f32.mxu0 %vm268_vm0, %v225_v5  ;;  %v226_v8 = vld [vmem:[%s1595_s8 + $0x8] sm:$0xff]  ;;  %v227_v10 = vld [vmem:[%s1595_s8 + $0x10] sm:$0xff]  ;;  %s1848_s11 = scalar_lea.vmem [#allocation7], %s1036_s10  ;;  %s1971_s26 = scalar_lea.hbm %s2033_s3, %s1076_s9 }
  0x5d   : > { %1145 = vmatprep.mubr.msk.f32.mxu1 %vm268_vm0, %v241_v6  ;;  %1170 = vmatprep.subr.bf16.mxu0 %v1169_v3  ;;  %v242_v9 = vld [vmem:[%s1595_s8 + $0x88] sm:$0xff]  ;;  %v243_v11 = vld [vmem:[%s1595_s8 + $0x90] sm:$0xff]  ;;  %v228_v12 = vld [vmem:[%s1595_s8 + $0x18] sm:$0xff]  ;;  %s928_s18 = sshll.u32 %s1848_s11, 4  ;;  %s912_s15 = scalar_lea.sflag [#allocation4], %s1591_s30  ;;  %s1973_s18 = int_to_ptr.vmem [resolvable:$true] %s928_s18 }
  0x5e   : > { %1177 = vmatprep.subr.bf16.mxu1 %v1169_v3  ;;  %1172 = vmatpush3.bf16.msra.mxu0 %v1169_v3  ;;  %v244_v13 = vld [vmem:[%s1595_s8 + $0x98] sm:$0xff]  ;;  %v229_v14 = vld [vmem:[%s1595_s8 + $0x20] sm:$0xff]  ;;  %v230_v16 = vld [vmem:[%s1595_s8 + $0x28] sm:$0xff]  ;;  %s1317_s21 = scalar_lea.vmem %s1973_s18, 8192  ;;  %s1410_s4 = smov [#allocation7]  }
  0x5f   : > { %1179 = vmatpush3.bf16.msra.mxu1 %v1169_v3  ;;  %1174 = vmatprep.subr.bf16.mxu0 %v1173_v7  ;;  %v245_v15 = vld [vmem:[%s1595_s8 + $0xa0] sm:$0xff]  ;;  %v246_v17 = vld [vmem:[%s1595_s8 + $0xa8] sm:$0xff]  ;;  %v231_v18 = vld [vmem:[%s1595_s8 + $0x30] sm:$0xff]  ;;  %p1318_p4 = scmp.ne.s32.totalorder %s1973_s18, %s1317_s21  ;;  %s1321_s6 = sshll.u32 %s1410_s4, 4  ;;  %s1322_s6 = int_to_ptr.vmem [resolvable:$false] %s1321_s6 }
  0x60   : > { %1178 = vmatprep.subr.bf16.mxu1 %v1173_v7  ;;  %v247_v19 = vld [vmem:[%s1595_s8 + $0xb0] sm:$0xff]  ;;  %v232_v20 = vld [vmem:[%s1595_s8 + $0x38] sm:$0xff]  ;;  %v233_v22 = vld [vmem:[%s1595_s8 + $0x40] sm:$0xff]  ;;  %s1323_s29 = scalar_lea.vmem %s1322_s6, 16384  ;;  %p1324_p12 = scmp.lt.s32.totalorder %s1973_s18, %s1322_s6 }
  0x61   : > { %v248_v21 = vld [vmem:[%s1595_s8 + $0xb8] sm:$0xff]  ;;  %v249_v23 = vld [vmem:[%s1595_s8 + $0xc0] sm:$0xff]  ;;  %v234_v24 = vld [vmem:[%s1595_s8 + $0x48] sm:$0xff]  ;;  %p1319_p6 = pnand %p1318_p4, %p1532_p10  ;;  %p1325_p11 = scmp.lt.s32.totalorder %s1323_s29, %s1317_s21 }
  0x62   : > { %1176 = vmatpush3.bf16.msra.mxu0 %v1173_v7  ;;  %v250_v25 = vld [vmem:[%s1595_s8 + $0xc8] sm:$0xff]  ;;  %v235_v26 = vld [vmem:[%s1595_s8 + $0x50] sm:$0xff]  ;;  %v236_v28 = vld [vmem:[%s1595_s8 + $0x58] sm:$0xff] }
  0x63   : > { %1180 = vmatpush3.bf16.msra.mxu1 %v1173_v7  ;;  %v251_v27 = vld [vmem:[%s1595_s8 + $0xd0] sm:$0xff]  ;;  %v252_v29 = vld [vmem:[%s1595_s8 + $0xd8] sm:$0xff]  ;;  %v237_v30 = vld [vmem:[%s1595_s8 + $0x60] sm:$0xff]  ;;  %p1320_p8 = pneg %p1319_p6  ;;  %p1326_p0 = por %p1325_p11, %p1324_p12 }
  0x64   : > { %v253_v31 = vld [vmem:[%s1595_s8 + $0xe0] sm:$0xff]  ;;  %v238_v32 = vld [vmem:[%s1595_s8 + $0x68] sm:$0xff]  ;;  %v239_v34 = vld [vmem:[%s1595_s8 + $0x70] sm:$0xff] }
  0x65   : > { %1122 = vmatmul.mubr.msk.f32.vlgmr.msra.gmra.mrb[0].mxu0 %vm268_vm0, %v226_v8  ;;  %v254_v33 = vld [vmem:[%s1595_s8 + $0xe8] sm:$0xff]  ;;  %v255_v35 = vld [vmem:[%s1595_s8 + $0xf0] sm:$0xff]  ;;  %v240_v36 = vld [vmem:[%s1595_s8 + $0x78] sm:$0xff]  ;;  %p1327_p5 = pnand %p1326_p0, %p1320_p8 }
  0x66   : > { %1146 = vmatmul.mubr.msk.f32.vlgmr.msra.gmra.mrb[0].mxu1 %vm268_vm0, %v242_v9  ;;  %1124 = vmatprep.mubr.msk.f32.mxu0 %vm268_vm0, %v227_v10  ;;  %v256_v37 = vld [vmem:[%s1595_s8 + $0xf8] sm:$0xff]  ;;  %v1672_v38 = vld [vmem:[%s2032_s2] ss:$0 sm:$0xff] }
  0x67   : > { %1148 = vmatprep.mubr.msk.f32.mxu1 %vm268_vm0, %v243_v11 }
  0x69   : > { %1125 = vmatmul.mubr.msk.f32.gmra.mrb[2].mxu0 %vm268_vm0, %v228_v12 }
  0x6a   : > { %1149 = vmatmul.mubr.msk.f32.gmra.mrb[2].mxu1 %vm268_vm0, %v244_v13  ;;  %1127 = vmatprep.mubr.msk.f32.mxu0 %vm268_vm0, %v229_v14 }
  0x6b   : > { %1151 = vmatprep.mubr.msk.f32.mxu1 %vm268_vm0, %v245_v15 }
  0x6d   : > { %1128 = vmatmul.mubr.msk.f32.gmra.mrb[4].mxu0 %vm268_vm0, %v230_v16 }
  0x6e   : > { %1152 = vmatmul.mubr.msk.f32.gmra.mrb[4].mxu1 %vm268_vm0, %v246_v17  ;;  %1130 = vmatprep.mubr.msk.f32.mxu0 %vm268_vm0, %v231_v18 }
  0x6f   : > { %1154 = vmatprep.mubr.msk.f32.mxu1 %vm268_vm0, %v247_v19 }
  0x71   : > { %1131 = vmatmul.mubr.msk.f32.gmra.mrb[6].mxu0 %vm268_vm0, %v232_v20 }
  0x72   : > { %1155 = vmatmul.mubr.msk.f32.gmra.mrb[6].mxu1 %vm268_vm0, %v248_v21  ;;  %1133 = vmatprep.mubr.msk.f32.mxu0 %vm268_vm0, %v233_v22 }
  0x73   : > { %1157 = vmatprep.mubr.msk.f32.mxu1 %vm268_vm0, %v249_v23 }
  0x75   : > { %1134 = vmatmul.mubr.msk.f32.gmra.mrb[8].mxu0 %vm268_vm0, %v234_v24 }
  0x76   : > { %1158 = vmatmul.mubr.msk.f32.gmra.mrb[8].mxu1 %vm268_vm0, %v250_v25  ;;  %1136 = vmatprep.mubr.msk.f32.mxu0 %vm268_vm0, %v235_v26 }
  0x77   : > { %1160 = vmatprep.mubr.msk.f32.mxu1 %vm268_vm0, %v251_v27 }
  0x79   : > { %1137 = vmatmul.mubr.msk.f32.gmra.mrb[10].mxu0 %vm268_vm0, %v236_v28 }
  0x7a   : > { %1161 = vmatmul.mubr.msk.f32.gmra.mrb[10].mxu1 %vm268_vm0, %v252_v29  ;;  %1139 = vmatprep.mubr.msk.f32.mxu0 %vm268_vm0, %v237_v30 }
  0x7b   : > { %1163 = vmatprep.mubr.msk.f32.mxu1 %vm268_vm0, %v253_v31 }
  0x7d   : > { %1140 = vmatmul.mubr.msk.f32.gmra.mrb[12].mxu0 %vm268_vm0, %v238_v32 }
  0x7e   : > { %1164 = vmatmul.mubr.msk.f32.gmra.mrb[12].mxu1 %vm268_vm0, %v254_v33  ;;  %1142 = vmatprep.mubr.msk.f32.mxu0 %vm268_vm0, %v239_v34 }
  0x7f   : > { %1166 = vmatprep.mubr.msk.f32.mxu1 %vm268_vm0, %v255_v35 }
  0x81   : > { %1143 = vmatmul.mubr.msk.f32.gmra.mrb[14].mxu0 %vm268_vm0, %v240_v36 }
  0x82   : > { %1167 = vmatmul.mubr.msk.f32.gmra.mrb[14].mxu1 %vm268_vm0, %v256_v37 }
 0x138   : > { %v1123_v39 = vpop.f32.mrb[0].mxu0 }
 0x139   : > { %v1147_v40 = vpop.f32.mrb[0].mxu1  ;;  %v437_v41 = vadd.f32 %v1123_v39, %v1672_v38  ;;  %v431_v43 = vpop.f32.mrb[1].mxu0 }
 0x13a   : > { %v517_v42 = vadd.f32 %v1147_v40, %v1672_v38  ;;  %v511_v44 = vpop.f32.mrb[1].mxu1  ;;  %v432_v45 = vadd.f32 %v1672_v38, %v431_v43 }
 0x13b   : > { %vm591_vm2 = vcmp.ge.f32.partialorder %v437_v41, 0.0  ;;  %v623_v47 = vmul.f32 0.1, %v437_v41  ;;  %v512_v49 = vadd.f32 %v1672_v38, %v511_v44 }
 0x13c   : > { %vm607_vm1 = vcmp.ge.f32.partialorder %v517_v42, 0.0  ;;  %v639_v46 = vmul.f32 0.1, %v517_v42  ;;  %v622_v48 = vmul.f32 0.1, %v432_v45  ;;  %v1126_v50 = vpop.f32.mrb[2].mxu0 }
 0x13d   : > { %v1150_v51 = vpop.f32.mrb[2].mxu1  ;;  %v447_v52 = vadd.f32 %v1126_v50, %v1672_v38  ;;  %v441_v53 = vpop.f32.mrb[3].mxu0  ;;  %v1682_v57 = vsel %vm591_vm2, %v437_v41, %v623_v47  ;;  %vm590_vm3 = vcmp.ge.f32.partialorder %v432_v45, 0.0  ;;  %v638_v59 = vmul.f32 0.1, %v512_v49 }
 0x13e   : > { %v527_v54 = vadd.f32 %v1150_v51, %v1672_v38  ;;  %v1680_v55 = vsel %vm607_vm1, %v517_v42, %v639_v46  ;;  %v521_v56 = vpop.f32.mrb[3].mxu1  ;;  %720 = vrot.lane.b32.xlu0 %v1682_v57, %s1409_s24  ;;  %v442_v60 = vadd.f32 %v1672_v38, %v441_v53  ;;  %v1692_v1 = vsel %vm590_vm3, %v432_v45, %v622_v48 }
 0x13f   : > { %752 = vrot.lane.b32.xlu1 %v1680_v55, %s1409_s24  ;;  %v625_v58 = vmul.f32 0.1, %v447_v52  ;;  %vm593_vm4 = vcmp.ge.f32.partialorder %v447_v52, 0.0  ;;  %v522_v61 = vadd.f32 %v1672_v38, %v521_v56  ;;  %vm606_vm5 = vcmp.ge.f32.partialorder %v512_v49, 0.0 }
 0x140   : > { %v1129_v62 = vpop.f32.mrb[4].mxu0  ;;  %v641_v63 = vmul.f32 0.1, %v527_v54  ;;  %vm609_vm6 = vcmp.ge.f32.partialorder %v527_v54, 0.0  ;;  %v624_v5 = vmul.f32 0.1, %v442_v60  ;;  %v1698_v7 = vsel %vm606_vm5, %v512_v49, %v638_v59 }
 0x141   : > { %v1690_v0 = vsel %vm593_vm4, %v447_v52, %v625_v58  ;;  %v451_v2 = vpop.f32.mrb[5].mxu0  ;;  %v1153_v3 = vpop.f32.mrb[4].mxu1  ;;  %v640_v6 = vmul.f32 0.1, %v522_v61  ;;  %v457_v9 = vadd.f32 %v1129_v62, %v1672_v38  ;;  %vm592_vm7 = vcmp.ge.f32.partialorder %v442_v60, 0.0 }
 0x142   : > { %718 = vrot.lane.b32.xlu0 %v1692_v1, %s1409_s24  ;;  %v531_v4 = vpop.f32.mrb[5].mxu1  ;;  %v452_v10 = vadd.f32 %v1672_v38, %v451_v2  ;;  %v1702_v11 = vsel %vm609_vm6, %v527_v54, %v641_v63  ;;  %vm608_vm8 = vcmp.ge.f32.partialorder %v522_v61, 0.0  ;;  %v537_v15 = vadd.f32 %v1153_v3, %v1672_v38 }
 0x143   : > { %724 = vrot.lane.b32.xlu1 %v1690_v0, %s1409_s24  ;;  %v1709_v16 = vsel %vm592_vm7, %v442_v60, %v624_v5  ;;  %v627_v18 = vmul.f32 0.1, %v457_v9  ;;  %v532_v20 = vadd.f32 %v1672_v38, %v531_v4  ;;  %v1712_v21 = vsel %vm608_vm8, %v522_v61, %v640_v6 }
 0x144   : > { %v1132_v8 = vpop.f32.mrb[6].mxu0  ;;  %v626_v19 = vmul.f32 0.1, %v452_v10  ;;  %vm595_vm9 = vcmp.ge.f32.partialorder %v457_v9, 0.0  ;;  %vm594_vm10 = vcmp.ge.f32.partialorder %v452_v10, 0.0  ;;  %vm611_vm11 = vcmp.ge.f32.partialorder %v537_v15, 0.0 }
 0x145   : > { %v461_v12 = vpop.f32.mrb[7].mxu0  ;;  %v1156_v13 = vpop.f32.mrb[6].mxu1  ;;  %v643_v25 = vmul.f32 0.1, %v537_v15  ;;  %v467_v26 = vadd.f32 %v1132_v8, %v1672_v38  ;;  %v642_v28 = vmul.f32 0.1, %v532_v20  ;;  %v1720_v30 = vsel %vm595_vm9, %v457_v9, %v627_v18 }
 0x146   : > { %750 = vrot.lane.b32.xlu0 %v1698_v7, %s1409_s24  ;;  %v541_v14 = vpop.f32.mrb[7].mxu1  ;;  %v462_v29 = vadd.f32 %v1672_v38, %v461_v12  ;;  %v1722_v31 = vsel %vm594_vm10, %v452_v10, %v626_v19  ;;  %vm610_vm12 = vcmp.ge.f32.partialorder %v532_v20, 0.0  ;;  %v547_v36 = vadd.f32 %v1156_v13, %v1672_v38 }
 0x147   : > { %756 = vrot.lane.b32.xlu1 %v1702_v11, %s1409_s24  ;;  %v629_v35 = vmul.f32 0.1, %v467_v26  ;;  %v542_v40 = vadd.f32 %v1672_v38, %v541_v14  ;;  %v1730_v41 = vsel %vm611_vm11, %v537_v15, %v643_v25  ;;  %v1732_v42 = vsel %vm610_vm12, %v532_v20, %v642_v28 }
 0x148   : > { %v1135_v17 = vpop.f32.mrb[8].mxu0  ;;  %v628_v39 = vmul.f32 0.1, %v462_v29  ;;  %vm597_vm13 = vcmp.ge.f32.partialorder %v467_v26, 0.0  ;;  %vm596_vm14 = vcmp.ge.f32.partialorder %v462_v29, 0.0  ;;  %vm613_vm15 = vcmp.ge.f32.partialorder %v547_v36, 0.0 }
 0x149   : > { %v471_v22 = vpop.f32.mrb[9].mxu0  ;;  %v1159_v23 = vpop.f32.mrb[8].mxu1  ;;  %v645_v46 = vmul.f32 0.1, %v547_v36  ;;  %v477_v47 = vadd.f32 %v1135_v17, %v1672_v38  ;;  %v644_v49 = vmul.f32 0.1, %v542_v40  ;;  %v1742_v51 = vsel %vm597_vm13, %v467_v26, %v629_v35 }
 0x14a   : > { %754 = vrot.lane.b32.xlu0 %v1712_v21, %s1409_s24  ;;  %v551_v24 = vpop.f32.mrb[9].mxu1  ;;  %v472_v50 = vadd.f32 %v1672_v38, %v471_v22  ;;  %v1744_v52 = vsel %vm596_vm14, %v462_v29, %v628_v39  ;;  %vm612_vm0 = vcmp.ge.f32.partialorder %v542_v40, 0.0  ;;  %v557_v59 = vadd.f32 %v1159_v23, %v1672_v38 }
 0x14b   : > { %722 = vrot.lane.b32.xlu1 %v1709_v16, %s1409_s24  ;;  %v631_v58 = vmul.f32 0.1, %v477_v47  ;;  %v552_v61 = vadd.f32 %v1672_v38, %v551_v24  ;;  %v1756_v62 = vsel %vm613_vm15, %v547_v36, %v645_v46  ;;  %v1758_v63 = vsel %vm612_vm0, %v542_v40, %v644_v49 }
 0x14c   : > { %v1138_v27 = vpop.f32.mrb[10].mxu0  ;;  %v630_v60 = vmul.f32 0.1, %v472_v50  ;;  %vm599_vm1 = vcmp.ge.f32.partialorder %v477_v47, 0.0  ;;  %vm598_vm2 = vcmp.ge.f32.partialorder %v472_v50, 0.0  ;;  %vm615_vm3 = vcmp.ge.f32.partialorder %v557_v59, 0.0 }
 0x14d   : > { %v481_v32 = vpop.f32.mrb[11].mxu0  ;;  %v1162_v33 = vpop.f32.mrb[10].mxu1  ;;  %v647_v2 = vmul.f32 0.1, %v557_v59  ;;  %v487_v3 = vadd.f32 %v1138_v27, %v1672_v38  ;;  %v646_v4 = vmul.f32 0.1, %v552_v61  ;;  %v1766_v6 = vsel %vm599_vm1, %v477_v47, %v631_v58 }
 0x14e   : > { %726 = vrot.lane.b32.xlu0 %v1722_v31, %s1409_s24  ;;  %v561_v34 = vpop.f32.mrb[11].mxu1  ;;  %v482_v5 = vadd.f32 %v1672_v38, %v481_v32  ;;  %v1768_v8 = vsel %vm598_vm2, %v472_v50, %v630_v60  ;;  %vm614_vm4 = vcmp.ge.f32.partialorder %v552_v61, 0.0  ;;  %v567_v10 = vadd.f32 %v1162_v33, %v1672_v38 }
 0x14f   : > { %728 = vrot.lane.b32.xlu1 %v1720_v30, %s1409_s24  ;;  %v633_v9 = vmul.f32 0.1, %v487_v3  ;;  %v562_v13 = vadd.f32 %v1672_v38, %v561_v34  ;;  %v1776_v14 = vsel %vm615_vm3, %v557_v59, %v647_v2  ;;  %v1778_v15 = vsel %vm614_vm4, %v552_v61, %v646_v4 }
 0x150   : > { %v1141_v37 = vpop.f32.mrb[12].mxu0  ;;  %v632_v12 = vmul.f32 0.1, %v482_v5  ;;  %vm601_vm5 = vcmp.ge.f32.partialorder %v487_v3, 0.0  ;;  %vm600_vm6 = vcmp.ge.f32.partialorder %v482_v5, 0.0  ;;  %vm617_vm7 = vcmp.ge.f32.partialorder %v567_v10, 0.0 }
 0x151   : > { %v491_v43 = vpop.f32.mrb[13].mxu0  ;;  %v1165_v44 = vpop.f32.mrb[12].mxu1  ;;  %v649_v17 = vmul.f32 0.1, %v567_v10  ;;  %v497_v18 = vadd.f32 %v1141_v37, %v1672_v38  ;;  %v648_v19 = vmul.f32 0.1, %v562_v13  ;;  %v1786_v22 = vsel %vm601_vm5, %v487_v3, %v633_v9 }
 0x152   : > { %758 = vrot.lane.b32.xlu0 %v1732_v42, %s1409_s24  ;;  %v571_v45 = vpop.f32.mrb[13].mxu1  ;;  %v492_v20 = vadd.f32 %v1672_v38, %v491_v43  ;;  %v1788_v23 = vsel %vm600_vm6, %v482_v5, %v632_v12  ;;  %vm616_vm8 = vcmp.ge.f32.partialorder %v562_v13, 0.0  ;;  %v577_v25 = vadd.f32 %v1165_v44, %v1672_v38 }
 0x153   : > { %760 = vrot.lane.b32.xlu1 %v1730_v41, %s1409_s24  ;;  %v635_v24 = vmul.f32 0.1, %v497_v18  ;;  %v572_v27 = vadd.f32 %v1672_v38, %v571_v45  ;;  %v1796_v28 = vsel %vm617_vm7, %v567_v10, %v649_v17  ;;  %v1798_v29 = vsel %vm616_vm8, %v562_v13, %v648_v19 }
 0x154   : > { %v1739_v48 = vpop.f32.mrb[14].mxu0  ;;  %v634_v26 = vmul.f32 0.1, %v492_v20  ;;  %vm603_vm9 = vcmp.ge.f32.partialorder %v497_v18, 0.0  ;;  %vm602_vm10 = vcmp.ge.f32.partialorder %v492_v20, 0.0  ;;  %vm619_vm11 = vcmp.ge.f32.partialorder %v577_v25, 0.0 }
 0x155   : > { %v501_v53 = vpop.f32.mrb[15].mxu0  ;;  %v1746_v54 = vpop.f32.mrb[14].mxu1  ;;  %v651_v32 = vmul.f32 0.1, %v577_v25  ;;  %v507_v33 = vadd.f32 %v1739_v48, %v1672_v38  ;;  %v650_v34 = vmul.f32 0.1, %v572_v27  ;;  %v1807_v36 = vsel %vm603_vm9, %v497_v18, %v635_v24 }
 0x156   : > { %730 = vrot.lane.b32.xlu0 %v1744_v52, %s1409_s24  ;;  %v1752_v56 = vpop.f32.mrb[15].mxu1  ;;  %v502_v35 = vadd.f32 %v1672_v38, %v501_v53  ;;  %v1809_v37 = vsel %vm602_vm10, %v492_v20, %v634_v26  ;;  %vm618_vm12 = vcmp.ge.f32.partialorder %v572_v27, 0.0  ;;  %v587_v40 = vadd.f32 %v1746_v54, %v1672_v38 }
 0x157   : > { %732 = vrot.lane.b32.xlu1 %v1742_v51, %s1409_s24  ;;  %v637_v39 = vmul.f32 0.1, %v507_v33  ;;  %v582_v44 = vadd.f32 %v1672_v38, %v1752_v56  ;;  %v1819_v45 = vsel %vm619_vm11, %v577_v25, %v651_v32  ;;  %v1821_v46 = vsel %vm618_vm12, %v572_v27, %v650_v34 }
 0x158   : > { %v636_v43 = vmul.f32 0.1, %v502_v35  ;;  %vm605_vm13 = vcmp.ge.f32.partialorder %v507_v33, 0.0  ;;  %vm604_vm14 = vcmp.ge.f32.partialorder %v502_v35, 0.0  ;;  %v653_v47 = vmul.f32 0.1, %v587_v40 }
 0x159   : > { %v652_v48 = vmul.f32 0.1, %v582_v44  ;;  %v1827_v49 = vsel %vm605_vm13, %v507_v33, %v637_v39  ;;  %vm621_vm15 = vcmp.ge.f32.partialorder %v587_v40, 0.0  ;;  %vm620_vm0 = vcmp.ge.f32.partialorder %v582_v44, 0.0 }
 0x15a   : > { %762 = vrot.lane.b32.xlu0 %v1758_v63, %s1409_s24  ;;  %v1829_v50 = vsel %vm604_vm14, %v502_v35, %v636_v43  ;;  %v1835_v38 = vsel %vm621_vm15, %v587_v40, %v653_v47  ;;  %vm814_vm1 = vcmask 523264  }
 0x15b   : > { %764 = vrot.lane.b32.xlu1 %v1756_v62, %s1409_s24  ;;  %v1837_v53 = vsel %vm620_vm0, %v582_v44, %v652_v48 }
 0x15e   : > { %734 = vrot.lane.b32.xlu0 %v1768_v8, %s1409_s24 }
 0x15f   : > { %736 = vrot.lane.b32.xlu1 %v1766_v6, %s1409_s24 }
 0x162   : > { %766 = vrot.lane.b32.xlu0 %v1778_v15, %s1409_s24 }
 0x163   : > { %768 = vrot.lane.b32.xlu1 %v1776_v14, %s1409_s24 }
 0x166   : > { %738 = vrot.lane.b32.xlu0 %v1788_v23, %s1409_s24 }
 0x167   : > { %740 = vrot.lane.b32.xlu1 %v1786_v22, %s1409_s24 }
 0x16a   : > { %770 = vrot.lane.b32.xlu0 %v1798_v29, %s1409_s24 }
 0x16b   : > { %772 = vrot.lane.b32.xlu1 %v1796_v28, %s1409_s24 }
 0x16e   : > { %742 = vrot.lane.b32.xlu0 %v1809_v37, %s1409_s24 }
 0x16f   : > { %744 = vrot.lane.b32.xlu1 %v1807_v36, %s1409_s24 }
 0x172   : > { %774 = vrot.lane.b32.xlu0 %v1821_v46, %s1409_s24 }
 0x173   : > { %776 = vrot.lane.b32.xlu1 %v1819_v45, %s1409_s24 }
 0x176   : > { %746 = vrot.lane.b32.xlu0 %v1829_v50, %s1409_s24 }
 0x177   : > { %748 = vrot.lane.b32.xlu1 %v1827_v49, %s1409_s24 }
 0x17a   : > { %778 = vrot.lane.b32.xlu0 %v1837_v53, %s1409_s24 }
 0x17b   : > { %780 = vrot.lane.b32.xlu1 %v1835_v38, %s1409_s24 }
 0x1b0   : > { %v721_v56 = vpop.permute.xlu0 %720 }
 0x1b1   : > { %v753_v54 = vpop.permute.xlu1 %752  ;;  %v816_v59 = vsel %vm814_vm1, %v1682_v57, %v721_v56 }
 0x1b2   : > { %v832_v58 = vsel %vm814_vm1, %v1680_v55, %v753_v54  ;;  %848 = vst [vmem:[%s1848_s11 + $0x8] sm:$0xff] %v816_v59  ;;  %850 = vst [vmem:[%s1848_s11 + $0x18] sm:$0xff] %v816_v59 }
 0x1b3   : > { %880 = vst [vmem:[%s1848_s11 + $0x108] sm:$0xff] %v832_v58  ;;  %882 = vst [vmem:[%s1848_s11 + $0x118] sm:$0xff] %v832_v58 }
 0x1b4   : > { %v719_v57 = vpop.permute.xlu0 %718 }
 0x1b5   : > { %v725_v55 = vpop.permute.xlu1 %724  ;;  %v815_v61 = vsel %vm814_vm1, %v1692_v1, %v719_v57 }
 0x1b6   : > { %v818_v60 = vsel %vm814_vm1, %v1690_v0, %v725_v55  ;;  %847 = vst [vmem:[%s1848_s11] sm:$0xff] %v815_v61  ;;  %849 = vst [vmem:[%s1848_s11 + $0x10] sm:$0xff] %v815_v61 }
 0x1b7   : > { %852 = vst [vmem:[%s1848_s11 + $0x28] sm:$0xff] %v818_v60  ;;  %854 = vst [vmem:[%s1848_s11 + $0x38] sm:$0xff] %v818_v60 }
 0x1b8   : > { %v751_v3 = vpop.permute.xlu0 %750 }
 0x1b9   : > { %v757_v2 = vpop.permute.xlu1 %756  ;;  %v831_v5 = vsel %vm814_vm1, %v1698_v7, %v751_v3 }
 0x1ba   : > { %v834_v4 = vsel %vm814_vm1, %v1702_v11, %v757_v2  ;;  %879 = vst [vmem:[%s1848_s11 + $0x100] sm:$0xff] %v831_v5  ;;  %881 = vst [vmem:[%s1848_s11 + $0x110] sm:$0xff] %v831_v5 }
 0x1bb   : > { %884 = vst [vmem:[%s1848_s11 + $0x128] sm:$0xff] %v834_v4  ;;  %886 = vst [vmem:[%s1848_s11 + $0x138] sm:$0xff] %v834_v4 }
 0x1bc   : > { %v755_v1 = vpop.permute.xlu0 %754 }
 0x1bd   : > { %v723_v0 = vpop.permute.xlu1 %722  ;;  %v833_v10 = vsel %vm814_vm1, %v1712_v21, %v755_v1 }
 0x1be   : > { %v817_v9 = vsel %vm814_vm1, %v1709_v16, %v723_v0  ;;  %883 = vst [vmem:[%s1848_s11 + $0x120] sm:$0xff] %v833_v10  ;;  %885 = vst [vmem:[%s1848_s11 + $0x130] sm:$0xff] %v833_v10 }
 0x1bf   : > { %851 = vst [vmem:[%s1848_s11 + $0x20] sm:$0xff] %v817_v9  ;;  %853 = vst [vmem:[%s1848_s11 + $0x30] sm:$0xff] %v817_v9 }
 0x1c0   : > { %v727_v11 = vpop.permute.xlu0 %726 }
 0x1c1   : > { %v729_v7 = vpop.permute.xlu1 %728  ;;  %v819_v13 = vsel %vm814_vm1, %v1722_v31, %v727_v11 }
 0x1c2   : > { %v820_v12 = vsel %vm814_vm1, %v1720_v30, %v729_v7  ;;  %855 = vst [vmem:[%s1848_s11 + $0x40] sm:$0xff] %v819_v13  ;;  %857 = vst [vmem:[%s1848_s11 + $0x50] sm:$0xff] %v819_v13 }
 0x1c3   : > { %856 = vst [vmem:[%s1848_s11 + $0x48] sm:$0xff] %v820_v12  ;;  %858 = vst [vmem:[%s1848_s11 + $0x58] sm:$0xff] %v820_v12 }
 0x1c4   : > { %v759_v21 = vpop.permute.xlu0 %758 }
 0x1c5   : > { %v761_v16 = vpop.permute.xlu1 %760  ;;  %v835_v18 = vsel %vm814_vm1, %v1732_v42, %v759_v21 }
 0x1c6   : > { %v836_v17 = vsel %vm814_vm1, %v1730_v41, %v761_v16  ;;  %887 = vst [vmem:[%s1848_s11 + $0x140] sm:$0xff] %v835_v18  ;;  %889 = vst [vmem:[%s1848_s11 + $0x150] sm:$0xff] %v835_v18 }
 0x1c7   : > { %888 = vst [vmem:[%s1848_s11 + $0x148] sm:$0xff] %v836_v17  ;;  %890 = vst [vmem:[%s1848_s11 + $0x158] sm:$0xff] %v836_v17 }
 0x1c8   : > { %v731_v31 = vpop.permute.xlu0 %730 }
 0x1c9   : > { %v733_v30 = vpop.permute.xlu1 %732  ;;  %v821_v20 = vsel %vm814_vm1, %v1744_v52, %v731_v31 }
 0x1ca   : > { %v822_v19 = vsel %vm814_vm1, %v1742_v51, %v733_v30  ;;  %859 = vst [vmem:[%s1848_s11 + $0x60] sm:$0xff] %v821_v20  ;;  %861 = vst [vmem:[%s1848_s11 + $0x70] sm:$0xff] %v821_v20 }
 0x1cb   : > { %860 = vst [vmem:[%s1848_s11 + $0x68] sm:$0xff] %v822_v19  ;;  %862 = vst [vmem:[%s1848_s11 + $0x78] sm:$0xff] %v822_v19 }
 0x1cc   : > { %v763_v42 = vpop.permute.xlu0 %762 }
 0x1cd   : > { %v765_v41 = vpop.permute.xlu1 %764  ;;  %v837_v25 = vsel %vm814_vm1, %v1758_v63, %v763_v42 }
 0x1ce   : > { %v838_v24 = vsel %vm814_vm1, %v1756_v62, %v765_v41  ;;  %891 = vst [vmem:[%s1848_s11 + $0x160] sm:$0xff] %v837_v25  ;;  %893 = vst [vmem:[%s1848_s11 + $0x170] sm:$0xff] %v837_v25 }
 0x1cf   : > { %892 = vst [vmem:[%s1848_s11 + $0x168] sm:$0xff] %v838_v24  ;;  %894 = vst [vmem:[%s1848_s11 + $0x178] sm:$0xff] %v838_v24 }
 0x1d0   : > { %v735_v52 = vpop.permute.xlu0 %734 }
 0x1d1   : > { %v737_v51 = vpop.permute.xlu1 %736  ;;  %v823_v27 = vsel %vm814_vm1, %v1768_v8, %v735_v52 }
 0x1d2   : > { %v824_v26 = vsel %vm814_vm1, %v1766_v6, %v737_v51  ;;  %863 = vst [vmem:[%s1848_s11 + $0x80] sm:$0xff] %v823_v27  ;;  %865 = vst [vmem:[%s1848_s11 + $0x90] sm:$0xff] %v823_v27 }
 0x1d3   : > { %864 = vst [vmem:[%s1848_s11 + $0x88] sm:$0xff] %v824_v26  ;;  %866 = vst [vmem:[%s1848_s11 + $0x98] sm:$0xff] %v824_v26 }
 0x1d4   : > { %v767_v63 = vpop.permute.xlu0 %766 }
 0x1d5   : > { %v769_v62 = vpop.permute.xlu1 %768  ;;  %v839_v33 = vsel %vm814_vm1, %v1778_v15, %v767_v63 }
 0x1d6   : > { %v840_v32 = vsel %vm814_vm1, %v1776_v14, %v769_v62  ;;  %895 = vst [vmem:[%s1848_s11 + $0x180] sm:$0xff] %v839_v33  ;;  %897 = vst [vmem:[%s1848_s11 + $0x190] sm:$0xff] %v839_v33 }
 0x1d7   : > { %896 = vst [vmem:[%s1848_s11 + $0x188] sm:$0xff] %v840_v32  ;;  %898 = vst [vmem:[%s1848_s11 + $0x198] sm:$0xff] %v840_v32 }
 0x1d8   : > { %v739_v8 = vpop.permute.xlu0 %738 }
 0x1d9   : > { %v741_v6 = vpop.permute.xlu1 %740  ;;  %v825_v35 = vsel %vm814_vm1, %v1788_v23, %v739_v8 }
 0x1da   : > { %v826_v34 = vsel %vm814_vm1, %v1786_v22, %v741_v6  ;;  %867 = vst [vmem:[%s1848_s11 + $0xa0] sm:$0xff] %v825_v35  ;;  %869 = vst [vmem:[%s1848_s11 + $0xb0] sm:$0xff] %v825_v35 }
 0x1db   : > { %868 = vst [vmem:[%s1848_s11 + $0xa8] sm:$0xff] %v826_v34  ;;  %870 = vst [vmem:[%s1848_s11 + $0xb8] sm:$0xff] %v826_v34 }
 0x1dc   : > { %v771_v15 = vpop.permute.xlu0 %770 }
 0x1dd   : > { %v773_v14 = vpop.permute.xlu1 %772  ;;  %v841_v40 = vsel %vm814_vm1, %v1798_v29, %v771_v15 }
 0x1de   : > { %v842_v39 = vsel %vm814_vm1, %v1796_v28, %v773_v14  ;;  %899 = vst [vmem:[%s1848_s11 + $0x1a0] sm:$0xff] %v841_v40  ;;  %901 = vst [vmem:[%s1848_s11 + $0x1b0] sm:$0xff] %v841_v40 }
 0x1df   : > { %900 = vst [vmem:[%s1848_s11 + $0x1a8] sm:$0xff] %v842_v39  ;;  %902 = vst [vmem:[%s1848_s11 + $0x1b8] sm:$0xff] %v842_v39 }
 0x1e0   : > { %v743_v23 = vpop.permute.xlu0 %742 }
 0x1e1   : > { %v745_v22 = vpop.permute.xlu1 %744  ;;  %v827_v28 = vsel %vm814_vm1, %v1809_v37, %v743_v23 }
 0x1e2   : > { %v828_v43 = vsel %vm814_vm1, %v1807_v36, %v745_v22  ;;  %871 = vst [vmem:[%s1848_s11 + $0xc0] sm:$0xff] %v827_v28  ;;  %873 = vst [vmem:[%s1848_s11 + $0xd0] sm:$0xff] %v827_v28 }
 0x1e3   : > { %872 = vst [vmem:[%s1848_s11 + $0xc8] sm:$0xff] %v828_v43  ;;  %874 = vst [vmem:[%s1848_s11 + $0xd8] sm:$0xff] %v828_v43 }
 0x1e4   : > { %v775_v44 = vpop.permute.xlu0 %774 }
 0x1e5   : > { %v777_v29 = vpop.permute.xlu1 %776  ;;  %v843_v36 = vsel %vm814_vm1, %v1821_v46, %v775_v44 }
 0x1e6   : > { %v844_v47 = vsel %vm814_vm1, %v1819_v45, %v777_v29  ;;  %903 = vst [vmem:[%s1848_s11 + $0x1c0] sm:$0xff] %v843_v36  ;;  %905 = vst [vmem:[%s1848_s11 + $0x1d0] sm:$0xff] %v843_v36 }
 0x1e7   : > { %904 = vst [vmem:[%s1848_s11 + $0x1c8] sm:$0xff] %v844_v47  ;;  %906 = vst [vmem:[%s1848_s11 + $0x1d8] sm:$0xff] %v844_v47 }
 0x1e8   : > { %v747_v48 = vpop.permute.xlu0 %746 }
 0x1e9   : > { %v749_v37 = vpop.permute.xlu1 %748  ;;  %v829_v45 = vsel %vm814_vm1, %v1829_v50, %v747_v48 }
 0x1ea   : > { %v830_v54 = vsel %vm814_vm1, %v1827_v49, %v749_v37  ;;  %875 = vst [vmem:[%s1848_s11 + $0xe0] sm:$0xff] %v829_v45  ;;  %877 = vst [vmem:[%s1848_s11 + $0xf0] sm:$0xff] %v829_v45 }
 0x1eb   : > { %876 = vst [vmem:[%s1848_s11 + $0xe8] sm:$0xff] %v830_v54  ;;  %878 = vst [vmem:[%s1848_s11 + $0xf8] sm:$0xff] %v830_v54 }
 0x1ec   : > { %v779_v49 = vpop.permute.xlu0 %778 }
 0x1ed   : > { %v781_v46 = vpop.permute.xlu1 %780  ;;  %v845_v56 = vsel %vm814_vm1, %v1837_v53, %v779_v49 }
 0x1ee   : > { %v846_v50 = vsel %vm814_vm1, %v1835_v38, %v781_v46  ;;  %907 = vst [vmem:[%s1848_s11 + $0x1e0] sm:$0xff] %v845_v56  ;;  %909 = vst [vmem:[%s1848_s11 + $0x1f0] sm:$0xff] %v845_v56 }
 0x1ef   : > { %908 = vst [vmem:[%s1848_s11 + $0x1e8] sm:$0xff] %v846_v50  ;;  %910 = vst [vmem:[%s1848_s11 + $0x1f8] sm:$0xff] %v846_v50 }
 0x1f0   : > { %1330 = shalt.err (!%p1327_p5)
}
 0x1f1   : > { %s1331_s7 = scalar_lea.hbm %s1971_s26, 8192  ;;  %s1335_s22 = scalar_lea.hbm %s2033_s3, 16384 }
 0x1f2   : > { %p1332_p9 = scmp.ne.s32.totalorder %s1971_s26, %s1331_s7  ;;  %p1336_p3 = scmp.lt.u32.totalorder %s1971_s26, %s2033_s3 }
 0x1f3   : > { %p1337_p7 = scmp.lt.u32.totalorder %s1335_s22, %s1331_s7  ;;  %p1339_p4 = scmp.lt.u32.totalorder %s1331_s7, %s1971_s26 }
 0x1f4   : > { %p1333_p1 = pnand %p1332_p9, %p1532_p10 }
 0x1f5   : > { %p1338_p13 = por %p1337_p7, %p1336_p3 }
 0x1f6   : > { %p1334_p2 = pneg %p1333_p1 }
 0x1f7   : > { %p1340_p6 = por %p1339_p4, %p1338_p13 }
 0x1f9   : > { %p1341_p8 = pnand %p1340_p6, %p1334_p2 }
 0x1fb   : > { %1344 = shalt.err (!%p1341_p8)
}
 0x1fc   : > { %s1411_s11 = smov 128   ;;  %s1412_s9 = smov 8  }
 0x1fd   : > { %1187 = dma.vmem_to_hbm [thread:$0]  (%p1532_p10), %s1973_s18, 8192, %s1971_s26, %s912_s15, %s1411_s11, %s1411_s11, %s1412_s9  }
 0x1fe PF: > { %s943_s19 = sand.u32 1, %s1383_s12   ;;  %p2051_p12 = scmp.ne.s32.totalorder %s2041_s23, 0 }
 0x1ff   : > { %p2052_p11 = scmp.ge.s32.totalorder %s1403_s17, 2  ;;  %s944_s25 = scalar_lea.sflag [#allocation4], %s943_s19 }
 0x201   : > { %p1198_p0 = pnand %p2052_p11, %p2051_p12 }
 0x203   : > { %1378 = dma.done.wait (!%p1198_p0), %s944_s25, 8192  }
 0x204   : > { %1380 = vsyncadd (!%p1198_p0), %s944_s25, 4294959104  ;;  %s20_s17 = sadd.s32 1, %s1403_s17   ;;  %s2053_s12 = smov %s1387_s13 }
 0x205   : > { %p17_p5 = scmp.ge.s32.totalorder %s20_s17, 4   ;;  %s2054_s13 = smov %s1391_s14 }
 0x206   : > { %s2055_s14 = smov %s1541_s5  ;;  %s2056_s15 = smov %s1399_s16 }
 0x207   : > { %s2057_s16 = smov %s2059_s28  ;;  %19 = sbr.rel (!%p17_p5) target bundleno = 7 (0x7), region = 81 }
 0x20e   :  { %949 = vsyncpa [#allocation3], 1 }
 0x20f   :  { %951 = vsyncpa [#allocation3 + $0x1], 1 }
 0x210   :  { %952 = vsyncpa [#allocation6], 1 }
 0x211   :  { %953 = vsyncpa [#allocation4], 1 }
 0x212   :  { %955 = vsyncpa [#allocation4 + $0x1], 1 }

</bundles_post_ra>
